<compile_context>
chip_gen: v5e
topology: v5e:2x2
jax: 0.10.0
libtpu: 0.0.40
codegen_flags: <defaults>
</compile_context>

<pallas_src>
import functools

import jax
import jax.numpy as jnp
from jax.experimental import pallas as pl
from jax.experimental.pallas import tpu as pltpu


def _round_up(x, m):
    return (x + m - 1) // m * m


def _mmd_rbf_kernel(i_tbl_ref, j_tbl_ref, ninv_ref,              # scalar prefetch (SMEM)
                    rows_ref, cols_ref, sqr_ref, sqc_ref,        # inputs (VMEM)
                    wr_ref, wc_ref,
                    out_ref,                                     # output (VMEM)
                    *, kernel_num, use_exp_squaring, inv_b2):
    s = pl.program_id(0)
    i_blk = i_tbl_ref[s]
    j_blk = j_tbl_ref[s]

    rows = rows_ref[...]                       # (T, Dp), native dtype (f32/bf16)
    cols = cols_ref[...]                       # (T, Dp)

    # <x_i, x_j> block on the MXU, contracting the feature (lane) dim of both
    # operands directly -- no transpose / relayout of either tile.
    gram = jax.lax.dot_general(
        rows, cols,
        dimension_numbers=(((1,), (1,)), ((), ())),
        preferred_element_type=jnp.float32)                      # (T, T)

    # ||x_i - x_j||^2 from wrapper-precomputed squared norms; clamp tiny
    # negatives from the norm expansion.
    l2 = jnp.maximum(sqr_ref[...] + sqc_ref[...] - 2.0 * gram, 0.0)   # (T, T)

    # Multi-bandwidth RBF sum.
    if use_exp_squaring:
        # kernel_mul == 2: one EUP exp at the LARGEST bandwidth, the remaining
        # (smaller) bandwidths via repeated squaring on the VPU.
        e = jnp.exp(l2 * ninv_ref[kernel_num - 1])
        ksum = e
        for _ in range(kernel_num - 1):
            e = e * e
            ksum = ksum + e
    else:
        ksum = jnp.exp(l2 * ninv_ref[0])
        for k in range(1, kernel_num):
            ksum = ksum + jnp.exp(l2 * ninv_ref[k])

    # Single sign-weighted block reduction on the MXU (w = +1 for XX/YY, -1 for
    # XY/YX, 0 for padded rows/cols):  sum_ij w_i * ksum_ij * w_j.
    row_red = jax.lax.dot_general(
        wr_ref[...], ksum,
        dimension_numbers=(((1,), (0,)), ((), ())),
        preferred_element_type=jnp.float32)                      # (1, T)
    part = jax.lax.dot_general(
        row_red, wc_ref[...],
        dimension_numbers=(((1,), (1,)), ((), ())),
        preferred_element_type=jnp.float32)                      # (1, 1)

    # Only j_blk >= i_blk is visited: off-diagonal blocks of the symmetric
    # pairwise matrix count twice.  Fold in the 1/B^2 normalizer as well.
    scale = jnp.where(i_blk == j_blk, inv_b2, 2.0 * inv_b2)

    # Lane-dense per-step partial (written exactly once per grid step).
    out_ref[...] = jnp.broadcast_to(part * scale, out_ref.shape)


class MMDLossPallas:
    """Pallas/TPU implementation of MMDLoss (rbf kernel type)."""

    def __init__(self, kernel_type="rbf", kernel_mul=2.0, kernel_num=5,
                 fix_sigma=None, **kwargs):
        self.kernel_type = kernel_type
        self.kernel_mul = float(kernel_mul)
        self.kernel_num = int(kernel_num)
        self.fix_sigma = None  # matches the PyTorch module (ctor stores None)

    def __call__(self, source, target, *, max_tile=512):
        if self.kernel_type == "linear":
            # linear_mmd2 is an O(D) reduction -- no benefit from a Pallas kernel.
            delta = (jnp.mean(source.astype(jnp.float32), axis=0)
                     - jnp.mean(target.astype(jnp.float32), axis=0))
            return jnp.dot(delta, delta)
        assert self.kernel_type == "rbf"
        # TODO(synk): fix_sigma path unreachable (ctor stores None), as in PyTorch.

        B, D = source.shape
        assert target.shape == (B, D)

        n = 2 * B                                   # n_samples
        d_pad = _round_up(D, 128)                   # lane-dense feature dim
        max_tile = max(128, int(max_tile) // 128 * 128)
        tile = min(max_tile, _round_up(n, 128))     # multiple of 128 -> all dots aligned
        n_pad = _round_up(n, tile)
        nb = n_pad // tile

        # Flattened upper-triangular block-index tables (scalar prefetch).
        i_idx, j_idx = [], []
        for a in range(nb):
            for b in range(a, nb):
                i_idx.append(a)
                j_idx.append(b)
        nb_tri = len(i_idx)
        i_tbl = jnp.asarray(i_idx, dtype=jnp.int32)
        j_tbl = jnp.asarray(j_idx, dtype=jnp.int32)

        # Concatenate + zero-pad in the wrapper (zeros change neither norms nor
        # inner products).  Keep bf16 inputs bf16 for the native MXU gram.
        total = jnp.concatenate([source, target], axis=0)
        if total.dtype not in (jnp.float32, jnp.bfloat16):
            total = total.astype(jnp.float32)
        total = jnp.pad(total, ((0, n_pad - n), (0, d_pad - D)))

        # Per-row squared norms once (reused for the bandwidth AND the kernel).
        t32 = total.astype(jnp.float32)
        sq = jnp.sum(t32 * t32, axis=1)                          # (n_pad,)
        sq_col = sq.reshape(n_pad, 1)
        sq_row = sq.reshape(1, n_pad)

        # Closed-form bandwidth: sum(L2) = 2n*sum||x||^2 - 2*||sum x||^2, O(n*D).
        sum_sq = jnp.sum(sq)
        col_sum = jnp.sum(t32, axis=0)
        sum_l2 = 2.0 * n * sum_sq - 2.0 * jnp.sum(col_sum * col_sum)
        bandwidth = sum_l2 / float(n * n - n)
        bandwidth = bandwidth / (self.kernel_mul ** (self.kernel_num // 2))
        bw_list = bandwidth * (self.kernel_mul
                               ** jnp.arange(self.kernel_num, dtype=jnp.float32))
        neg_inv_bw = (-1.0 / bw_list).astype(jnp.float32)        # (kernel_num,)

        # Sign weights: +1 for XX/YY rows, -1 for XY/YX, 0 for padded rows.
        idx = jnp.arange(n_pad)
        w_row = jnp.where(idx < B, 1.0,
                          jnp.where(idx < n, -1.0, 0.0)).astype(jnp.float32)
        w_row = w_row.reshape(1, n_pad)

        use_exp_squaring = (self.kernel_mul == 2.0)

        kernel = functools.partial(
            _mmd_rbf_kernel,
            kernel_num=self.kernel_num,
            use_exp_squaring=use_exp_squaring,
            inv_b2=1.0 / float(B * B),
        )

        # VMEM budget: double-buffered row/col tiles + f32 pairwise intermediates
        # (clamped well under the 64 MiB physical VMEM of a v7x TensorCore).
        itemsize = jnp.dtype(total.dtype).itemsize
        vmem_est = (5 * tile * d_pad * itemsize
                    + 8 * tile * tile * 4
                    + (1 << 20))
        vmem_limit = int(min(max(vmem_est, 16 * 1024 * 1024), 40 * 1024 * 1024))

        grid_spec = pltpu.PrefetchScalarGridSpec(
            num_scalar_prefetch=3,                  # i_tbl, j_tbl, neg_inv_bw
            grid=(nb_tri,),
            in_specs=[
                pl.BlockSpec((tile, d_pad), lambda s, it, jt, nv: (it[s], 0)),   # row tile
                pl.BlockSpec((tile, d_pad), lambda s, it, jt, nv: (jt[s], 0)),   # col tile
                pl.BlockSpec((tile, 1),     lambda s, it, jt, nv: (it[s], 0)),   # row norms
                pl.BlockSpec((1, tile),     lambda s, it, jt, nv: (0, jt[s])),   # col norms
                pl.BlockSpec((1, tile),     lambda s, it, jt, nv: (0, it[s])),   # row weights
                pl.BlockSpec((1, tile),     lambda s, it, jt, nv: (0, jt[s])),   # col weights
            ],
            out_specs=pl.BlockSpec((1, 128), lambda s, it, jt, nv: (0, s)),
        )

        out = pl.pallas_call(
            kernel,
            grid_spec=grid_spec,
            out_shape=jax.ShapeDtypeStruct((1, nb_tri * 128), jnp.float32),
            compiler_params=pltpu.CompilerParams(
                dimension_semantics=("parallel",),   # independent steps -> megacore
                vmem_limit_bytes=vmem_limit,
            ),
        )(i_tbl, j_tbl, neg_inv_bw,
          total, total, sq_col, sq_row, w_row, w_row)

        # Each step broadcast its partial across 128 lanes; take lane 0 and sum.
        partials = out.reshape(nb_tri, 128)[:, 0]
        return jnp.sum(partials)


def _mmd_rbf_reference(source, target, kernel_mul=2.0, kernel_num=5):
    """Pure-JAX reference mirroring the PyTorch code."""
    s = source.astype(jnp.float32)
    t = target.astype(jnp.float32)
    total = jnp.concatenate([s, t], axis=0)
    n = total.shape[0]
    diff = total[None, :, :] - total[:, None, :]
    l2 = jnp.sum(diff * diff, axis=2)
    bandwidth = jnp.sum(l2) / (n * n - n)
    bandwidth = bandwidth / (kernel_mul ** (kernel_num // 2))
    kernels = sum(jnp.exp(-l2 / (bandwidth * kernel_mul ** i))
                  for i in range(kernel_num))
    b = n // 2
    xx = jnp.mean(kernels[:b, :b])
    yy = jnp.mean(kernels[b:, b:])
    xy = jnp.mean(kernels[:b, b:])
    yx = jnp.mean(kernels[b:, :b])
    return xx + yy - xy - yx


if __name__ == "__main__":
    key = jax.random.PRNGKey(0)
    k1, k2, k3, k4, k5, k6 = jax.random.split(key, 6)

    mmd = MMDLossPallas(kernel_type="rbf", kernel_mul=2.0, kernel_num=5)

    # Small case: single triangular block, feature dim padded 32 -> 128,
    # heavy zero-weighted row padding (16 valid rows of a 128-row tile).
    B, D = 8, 32
    source = jax.random.normal(k1, (B, D), dtype=jnp.float32)
    target = jax.random.normal(k2, (B, D), dtype=jnp.float32) + 0.5
    loss = jax.block_until_ready(mmd(source, target))
    ref = _mmd_rbf_reference(source, target)
    assert jnp.allclose(loss, ref, rtol=1e-3, atol=2e-5), (loss, ref)

    # Larger, non-aligned case: max_tile=128 forces a 3x3 block space ->
    # 6 triangular grid steps, off-diagonal x2 scaling, padded last block.
    B2, D2 = 160, 40
    src2 = jax.random.normal(k3, (B2, D2), dtype=jnp.float32)
    tgt2 = jax.random.normal(k4, (B2, D2), dtype=jnp.float32) + 0.25
    loss2 = jax.block_until_ready(mmd(src2, tgt2, max_tile=128))
    ref2 = _mmd_rbf_reference(src2, tgt2)
    assert jnp.allclose(loss2, ref2, rtol=2e-3, atol=2e-5), (loss2, ref2)

    # bf16 inputs: tiles stay bf16 through the MXU gram; norms/exp math in f32.
    B3, D3 = 32, 48
    src3 = jax.random.normal(k5, (B3, D3), dtype=jnp.bfloat16)
    tgt3 = (jax.random.normal(k6, (B3, D3), dtype=jnp.bfloat16)
            + 1.0).astype(jnp.bfloat16)
    loss3 = jax.block_until_ready(mmd(src3, tgt3))
    ref3 = _mmd_rbf_reference(src3, tgt3)
    assert jnp.allclose(loss3, ref3, rtol=1e-1, atol=1e-2), (loss3, ref3)

    print("KERNEL_OK")
</pallas_src>

<mosaic_0001>
module attributes {stable_mosaic.version = 11 : i64} {
  func.func @_mmd_rbf_kernel(%arg0: i32, %arg1: memref<1xi32, #tpu.memory_space<smem>>, %arg2: memref<1xi32, #tpu.memory_space<smem>>, %arg3: memref<5xf32, #tpu.memory_space<smem>>, %arg4: memref<128x128xf32, #tpu.memory_space<vmem>>, %arg5: memref<128x128xf32, #tpu.memory_space<vmem>>, %arg6: memref<128x1xf32, #tpu.memory_space<vmem>>, %arg7: memref<1x128xf32, #tpu.memory_space<vmem>>, %arg8: memref<1x128xf32, #tpu.memory_space<vmem>>, %arg9: memref<1x128xf32, #tpu.memory_space<vmem>>, %arg10: memref<1x128xf32, #tpu.memory_space<vmem>>) attributes {dimension_semantics = [#tpu.dimension_semantics<parallel>], iteration_bounds = array<i64: 1>, scalar_prefetch = 3 : i64, scratch_operands = 0 : i64, tpu.core_type = #tpu.core_type<tc>, window_params = [{transform_indices = @transform_0, window_bounds = array<i64: 128, 128>}, {transform_indices = @transform_1, window_bounds = array<i64: 128, 128>}, {transform_indices = @transform_2, window_bounds = array<i64: 128, 1>}, {transform_indices = @transform_3, window_bounds = array<i64: 1, 128>}, {transform_indices = @transform_4, window_bounds = array<i64: 1, 128>}, {transform_indices = @transform_5, window_bounds = array<i64: 1, 128>}, {transform_indices = @transform_6, window_bounds = array<i64: 1, 128>}]} {
    %0 = arith.index_cast %arg0 : i32 to index
    %1 = memref.load %arg1[%0] : memref<1xi32, #tpu.memory_space<smem>>
    %2 = arith.index_cast %arg0 : i32 to index
    %3 = memref.load %arg2[%2] : memref<1xi32, #tpu.memory_space<smem>>
    %c0 = arith.constant 0 : index
    %c0_0 = arith.constant 0 : index
    %4 = vector.load %arg4[%c0, %c0_0] : memref<128x128xf32, #tpu.memory_space<vmem>>, vector<128x128xf32>
    %c0_1 = arith.constant 0 : index
    %c0_2 = arith.constant 0 : index
    %5 = vector.load %arg5[%c0_1, %c0_2] : memref<128x128xf32, #tpu.memory_space<vmem>>, vector<128x128xf32>
    %cst = arith.constant dense<0.000000e+00> : vector<128x128xf32>
    %6 = tpu.matmul %4, %5, %cst {dimension_numbers = #tpu.dot_dimension_numbers<[1], [1], [0], [0], [0, 0, 1, 0], [], []>} : vector<128x128xf32>, vector<128x128xf32>, vector<128x128xf32> -> vector<128x128xf32>
    %c0_3 = arith.constant 0 : index
    %c0_4 = arith.constant 0 : index
    %7 = vector.load %arg6[%c0_3, %c0_4] : memref<128x1xf32, #tpu.memory_space<vmem>>, vector<128x1xf32>
    %c0_5 = arith.constant 0 : index
    %c0_6 = arith.constant 0 : index
    %8 = vector.load %arg7[%c0_5, %c0_6] : memref<1x128xf32, #tpu.memory_space<vmem>>, vector<1x128xf32>
    %9 = vector.broadcast %7 : vector<128x1xf32> to vector<128x128xf32>
    %10 = vector.broadcast %8 : vector<1x128xf32> to vector<128x128xf32>
    %11 = arith.addf %9, %10 : vector<128x128xf32>
    %cst_7 = arith.constant 2.000000e+00 : f32
    %12 = vector.broadcast %cst_7 : f32 to vector<128x128xf32>
    %13 = arith.mulf %12, %6 : vector<128x128xf32>
    %14 = arith.subf %11, %13 : vector<128x128xf32>
    %cst_8 = arith.constant 0.000000e+00 : f32
    %15 = vector.broadcast %cst_8 : f32 to vector<128x128xf32>
    %16 = arith.maximumf %14, %15 : vector<128x128xf32>
    %c4 = arith.constant 4 : index
    %17 = memref.load %arg3[%c4] : memref<5xf32, #tpu.memory_space<smem>>
    %18 = vector.broadcast %17 : f32 to vector<128x128xf32>
    %19 = arith.mulf %16, %18 : vector<128x128xf32>
    %20 = math.exp %19 : vector<128x128xf32>
    %21 = arith.mulf %20, %20 : vector<128x128xf32>
    %22 = arith.addf %20, %21 : vector<128x128xf32>
    %23 = arith.mulf %21, %21 : vector<128x128xf32>
    %24 = arith.addf %22, %23 : vector<128x128xf32>
    %25 = arith.mulf %23, %23 : vector<128x128xf32>
    %26 = arith.addf %24, %25 : vector<128x128xf32>
    %27 = arith.mulf %25, %25 : vector<128x128xf32>
    %28 = arith.addf %26, %27 : vector<128x128xf32>
    %c0_9 = arith.constant 0 : index
    %c0_10 = arith.constant 0 : index
    %29 = vector.load %arg8[%c0_9, %c0_10] : memref<1x128xf32, #tpu.memory_space<vmem>>, vector<1x128xf32>
    %cst_11 = arith.constant dense<0.000000e+00> : vector<1x128xf32>
    %30 = tpu.matmul %29, %28, %cst_11 {dimension_numbers = #tpu.dot_dimension_numbers<[1], [0], [0], [1], [0, 0, 1, 1], [], []>} : vector<1x128xf32>, vector<128x128xf32>, vector<1x128xf32> -> vector<1x128xf32>
    %c0_12 = arith.constant 0 : index
    %c0_13 = arith.constant 0 : index
    %31 = vector.load %arg9[%c0_12, %c0_13] : memref<1x128xf32, #tpu.memory_space<vmem>>, vector<1x128xf32>
    %cst_14 = arith.constant dense<0.000000e+00> : vector<1x1xf32>
    %32 = tpu.matmul %30, %31, %cst_14 {dimension_numbers = #tpu.dot_dimension_numbers<[1], [1], [0], [0], [0, 0, 1, 0], [], []>} : vector<1x128xf32>, vector<1x128xf32>, vector<1x1xf32> -> vector<1x1xf32>
    %33 = arith.cmpi eq, %1, %3 : i32
    %cst_15 = arith.constant 1.562500e-02 : f32
    %cst_16 = arith.constant 3.125000e-02 : f32
    %34 = arith.select %33, %cst_15, %cst_16 : f32
    %35 = vector.broadcast %34 : f32 to vector<1x1xf32>
    %36 = arith.mulf %32, %35 : vector<1x1xf32>
    %37 = vector.shape_cast %36 : vector<1x1xf32> to vector<1x1xf32>
    %38 = vector.broadcast %37 : vector<1x1xf32> to vector<1x128xf32>
    %c0_17 = arith.constant 0 : index
    %c0_18 = arith.constant 0 : index
    %39 = vector.load %arg10[%c0_17, %c0_18] : memref<1x128xf32, #tpu.memory_space<vmem>>, vector<1x128xf32>
    tpu.vector_store %arg10[%c0_17, %c0_18], %38 {strides = array<i32>} : memref<1x128xf32, #tpu.memory_space<vmem>>, vector<1x128xf32>,
    return
  }
  func.func @transform_0(%arg0: i32, %arg1: memref<1xi32, #tpu.memory_space<smem>>, %arg2: memref<1xi32, #tpu.memory_space<smem>>, %arg3: memref<5xf32, #tpu.memory_space<smem>>) -> (i32, i32) {
    %0 = arith.index_cast %arg0 : i32 to index
    %1 = memref.load %arg1[%0] : memref<1xi32, #tpu.memory_space<smem>>
    %c0_i32 = arith.constant 0 : i32
    %c0_i32_0 = arith.constant 0 : i32
    return %1, %c0_i32 : i32, i32
  }
  func.func @transform_1(%arg0: i32, %arg1: memref<1xi32, #tpu.memory_space<smem>>, %arg2: memref<1xi32, #tpu.memory_space<smem>>, %arg3: memref<5xf32, #tpu.memory_space<smem>>) -> (i32, i32) {
    %0 = arith.index_cast %arg0 : i32 to index
    %1 = memref.load %arg2[%0] : memref<1xi32, #tpu.memory_space<smem>>
    %c0_i32 = arith.constant 0 : i32
    %c0_i32_0 = arith.constant 0 : i32
    return %1, %c0_i32 : i32, i32
  }
  func.func @transform_2(%arg0: i32, %arg1: memref<1xi32, #tpu.memory_space<smem>>, %arg2: memref<1xi32, #tpu.memory_space<smem>>, %arg3: memref<5xf32, #tpu.memory_space<smem>>) -> (i32, i32) {
    %0 = arith.index_cast %arg0 : i32 to index
    %1 = memref.load %arg1[%0] : memref<1xi32, #tpu.memory_space<smem>>
    %c0_i32 = arith.constant 0 : i32
    %c0_i32_0 = arith.constant 0 : i32
    return %1, %c0_i32 : i32, i32
  }
  func.func @transform_3(%arg0: i32, %arg1: memref<1xi32, #tpu.memory_space<smem>>, %arg2: memref<1xi32, #tpu.memory_space<smem>>, %arg3: memref<5xf32, #tpu.memory_space<smem>>) -> (i32, i32) {
    %0 = arith.index_cast %arg0 : i32 to index
    %1 = memref.load %arg2[%0] : memref<1xi32, #tpu.memory_space<smem>>
    %c0_i32 = arith.constant 0 : i32
    %c0_i32_0 = arith.constant 0 : i32
    return %c0_i32, %1 : i32, i32
  }
  func.func @transform_4(%arg0: i32, %arg1: memref<1xi32, #tpu.memory_space<smem>>, %arg2: memref<1xi32, #tpu.memory_space<smem>>, %arg3: memref<5xf32, #tpu.memory_space<smem>>) -> (i32, i32) {
    %0 = arith.index_cast %arg0 : i32 to index
    %1 = memref.load %arg1[%0] : memref<1xi32, #tpu.memory_space<smem>>
    %c0_i32 = arith.constant 0 : i32
    %c0_i32_0 = arith.constant 0 : i32
    return %c0_i32, %1 : i32, i32
  }
  func.func @transform_5(%arg0: i32, %arg1: memref<1xi32, #tpu.memory_space<smem>>, %arg2: memref<1xi32, #tpu.memory_space<smem>>, %arg3: memref<5xf32, #tpu.memory_space<smem>>) -> (i32, i32) {
    %0 = arith.index_cast %arg0 : i32 to index
    %1 = memref.load %arg2[%0] : memref<1xi32, #tpu.memory_space<smem>>
    %c0_i32 = arith.constant 0 : i32
    %c0_i32_0 = arith.constant 0 : i32
    return %c0_i32, %1 : i32, i32
  }
  func.func @transform_6(%arg0: i32, %arg1: memref<1xi32, #tpu.memory_space<smem>>, %arg2: memref<1xi32, #tpu.memory_space<smem>>, %arg3: memref<5xf32, #tpu.memory_space<smem>>) -> (i32, i32) {
    %c0_i32 = arith.constant 0 : i32
    %c0_i32_0 = arith.constant 0 : i32
    return %c0_i32, %arg0 : i32, i32
  }
}

</mosaic_0001>

<bundles_post_ra>
// kernel: tpu_custom_call.1
= control target key start
LH: loop header
LB: loop body
LE: loop exit
PB: predicated region body
PF: predicated region fallthrough
CT: control target
= control target key end

     0   :  { %s822_s12 = smov [#allocation5]   ;;  %s1031_s0 = inlined_call_operand.<no memory space> [shape: s32[1], index: 0, kind: input, shape index: {}]   ;;  %s1032_s1 = inlined_call_operand.<no memory space> [shape: s32[1], index: 1, kind: input, shape index: {}]   ;;  %s1033_s2 = inlined_call_operand.vmem [shape: f32[5], index: 2, kind: input, shape index: {}]   ;;  %s1034_s3 = inlined_call_operand.vmem [shape: f32[128,128], index: 3, kind: input, shape index: {}]   ;;  %s1035_s4 = inlined_call_operand.hbm [shape: f32[128,128], index: 4, kind: input, shape index: {}]   ;;  %s1036_s5 = inlined_call_operand.vmem [shape: f32[128,1], index: 5, kind: input, shape index: {}]   ;;  %s1037_s6 = inlined_call_operand.vmem [shape: f32[1,128], index: 6, kind: input, shape index: {}]   ;;  %s1038_s7 = inlined_call_operand.vmem [shape: f32[1,128], index: 7, kind: input, shape index: {}]   ;;  %s1039_s8 = inlined_call_operand.vmem [shape: f32[1,128], index: 8, kind: input, shape index: {}]   ;;  %s1040_s9 = inlined_call_operand.hbm [shape: f32[1,128], index: 9, kind: output, shape index: {}]  }
   0x1   :  { %s17_s11 = sshll.u32 %s1033_s2, 4  ;;  %s18_s11 = int_to_ptr.vmem [resolvable:$true] %s17_s11 }
   0x2   :  { %20 = dma.vmem_to_smem %s18_s11, 16, %s822_s12, [#allocation2] }
   0x3   :  { %816 = dma.done.wait [#allocation2], 16 }
   0x4   :  { %817 = vsyncadd [#allocation2], 4294967280 }
   0x5   :  { %23 = sfence }
   0x6   :  { %24 = vsyncpa [#allocation7], 0 }
   0x7   :  { %25 = vsyncpa [#allocation8], 0  ;;  %s665_s15 = sshll.u32 %s1032_s1, 7  ;;  %s823_s19 = smov [#allocation6]  }
   0x8   :  { %s43_s18 = scalar_lea.hbm %s1035_s4, %s665_s15  ;;  %s46_s20 = sshll.u32 %s823_s19, 4  ;;  %s47_s20 = int_to_ptr.vmem [resolvable:$true] %s46_s20 }
   0x9   :  { %s44_s21 = sshll.u32 %s43_s18, 4  ;;  %s772_s25 = scalar_lea.hbm %s1035_s4, 128  ;;  %s45_s21 = int_to_ptr.hbm [resolvable:$true] %s44_s21 }
   0xa   :  { %s768_s2 = sshra.s32 %s45_s21, 4  ;;  %s769_s2 = int_to_ptr.hbm [resolvable:$true] %s768_s2 }
   0xb   :  { %s770_s22 = scalar_lea.hbm %s769_s2, 128  ;;  %p773_p1 = scmp.lt.s32.totalorder %s769_s2, %s1035_s4 }
   0xc   :  { %p771_p0 = scmp.ne.s32.totalorder %s769_s2, %s770_s22  ;;  %p774_p2 = scmp.lt.s32.totalorder %s772_s25, %s770_s22 }
   0xe   :  { %p775_p3 = por %p774_p2, %p773_p1 }
  0x10   :  { %p776_p4 = pnand %p775_p3, %p771_p0 }
  0x12   :  { %779 = shalt.err (!%p776_p4)
}
  0x13   :  { %s824_s28 = smov 128   ;;  %s825_s29 = smov 8  }
  0x14   :  { %52 = dma.hbm_to_vmem [thread:$0]  %s45_s21, 2048, %s47_s20, [#allocation7], %s824_s28, %s824_s28, %s825_s29  }
  0x15   :  { %818 = dma.done.wait [#allocation7], 2048  }
  0x16   :  { %819 = vsyncadd [#allocation7], 4294965248  ;;  %p131_p5 = scmp.lt.s32.totalorder %s1032_s1, 0  ;;  %v178_v0 = vld [vmem:[#allocation6 + $0x78] sm:$0xff]  ;;  %v177_v1 = vld [vmem:[#allocation6 + $0x70] sm:$0xff]  ;;  %s660_s18 = sshll.u32 %s1031_s0, 4 }
  0x17   :  { %668 = vmatpush.xpose.msra.mxu3 %v178_v0  ;;  %666 = vmatpush.xpose.msra.mxu1 %v178_v0  ;;  %v176_v2 = vld [vmem:[#allocation6 + $0x68] sm:$0xff]  ;;  %v175_v3 = vld [vmem:[#allocation6 + $0x60] sm:$0xff]  ;;  %p114_p6 = scmp.lt.s32.totalorder %s660_s18, 15  ;;  %v174_v4 = vld [vmem:[#allocation6 + $0x58] sm:$0xff]  ;;  %v826_v9 = vmov 0   ;;  %s664_s25 = sld [smem:[#allocation5 + $0x4]] }
  0x18   :  { %s899_s13 = scalar_select %p131_p5, %s1032_s1, 0  ;;  %667 = vmatpush.xpose.msra.mxu2 %v178_v0  ;;  %179 = vmatpush.xpose.msra.mxu0 %v178_v0  ;;  %v173_v5 = vld [vmem:[#allocation6 + $0x50] sm:$0xff]  ;;  %v172_v6 = vld [vmem:[#allocation6 + $0x48] sm:$0xff]  ;;  %v171_v7 = vld [vmem:[#allocation6 + $0x40] sm:$0xff]  ;;  %vm609_vm0 = vcmask 1040384  }
  0x19   :  { %s1042_s18 = smov (!%p114_p6, %s660_s18), 15  ;;  %720 = vset.pattern.permute.xlu0 %v826_v9  ;;  %721 = vset.pattern.permute.xlu1 %v826_v9  ;;  %v170_v10 = vld [vmem:[#allocation6 + $0x38] sm:$0xff]  ;;  %v169_v12 = vld [vmem:[#allocation6 + $0x30] sm:$0xff]  ;;  %v168_v13 = vld [vmem:[#allocation6 + $0x28] sm:$0xff]  ;;  %p136_p7 = scmp.lt.s32.totalorder %s1031_s0, 0 }
  0x1a   :  { %s133_s15 = scalar_lea.vmem %s1037_s6, %s899_s13  ;;  %s661_s19 = sshll.u32 %s1042_s18, 3  ;;  %722 = vset.pattern.permute.xlu2 %v826_v9  ;;  %v167_v16 = vld [vmem:[#allocation6 + $0x20] sm:$0xff]  ;;  %v166_v17 = vld [vmem:[#allocation6 + $0x18] sm:$0xff]  ;;  %v165_v20 = vld [vmem:[#allocation6 + $0x10] sm:$0xff] }
  0x1b   :  { %671 = vmatpush.xpose.msra.mxu3 %v177_v1  ;;  %669 = vmatpush.xpose.msra.mxu1 %v177_v1  ;;  %s916_s2 = scalar_lea.vmem %s1036_s5, %s661_s19  ;;  %v164_v21 = vld [vmem:[#allocation6 + $0x8] sm:$0xff]  ;;  %v163_v24 = vld [vmem:[#allocation6] sm:$0xff]  ;;  %s931_s23 = scalar_lea.vmem %s1034_s3, %s661_s19 }
  0x1c   :  { %670 = vmatpush.xpose.msra.mxu2 %v177_v1  ;;  %180 = vmatpush.xpose.msra.mxu0 %v177_v1  ;;  %v259_v8 = vld [vmem:[%s916_s2 + $0x78] sm:$0xff]  ;;  %v258_v11 = vld [vmem:[%s916_s2 + $0x70] sm:$0xff]  ;;  %v257_v14 = vld [vmem:[%s916_s2 + $0x68] sm:$0xff]  ;;  %s137_s29 = scalar_select %p136_p7, %s1031_s0, 0 }
  0x1d   :  { %338 = vperm.xlu0 %720, %v259_v8   ;;  %v253_v15 = vld [vmem:[%s916_s2 + $0x48] sm:$0xff]  ;;  %328 = vperm.xlu1 %721, %v257_v14   ;;  %v256_v18 = vld [vmem:[%s916_s2 + $0x60] sm:$0xff]  ;;  %v250_v19 = vld [vmem:[%s916_s2 + $0x30] sm:$0xff]  ;;  %s143_s14 = scalar_lea.vmem %s1039_s8, %s899_s13  ;;  %p613_p8 = scmp.eq.s32.totalorder %s1031_s0, %s1032_s1 }
  0x1e   :  { %v252_v22 = vld [vmem:[%s916_s2 + $0x40] sm:$0xff]  ;;  %v247_v23 = vld [vmem:[%s916_s2 + $0x18] sm:$0xff]  ;;  %v249_v29 = vld [vmem:[%s916_s2 + $0x28] sm:$0xff]  ;;  %s138_s11 = scalar_lea.vmem %s1038_s7, %s137_s29  ;;  %s827_s19 = smov [#allocation9]  }
  0x1f   :  { %674 = vmatpush.xpose.msra.mxu3 %v176_v2  ;;  %672 = vmatpush.xpose.msra.mxu1 %v176_v2  ;;  %v158_v25 = vld [vmem:[%s931_s23 + $0x58] sm:$0xff]  ;;  %v147_v28 = vld [vmem:[%s931_s23] sm:$0xff]  ;;  %v148_v35 = vld [vmem:[%s931_s23 + $0x8] sm:$0xff]  ;;  %s614_s18 = scalar_select %p613_p8, 0.015625, 0.03125 }
  0x20   :  { %673 = vmatpush.xpose.msra.mxu2 %v176_v2  ;;  %181 = vmatpush.xpose.msra.mxu0 %v176_v2  ;;  %v150_v26 = vld [vmem:[%s931_s23 + $0x18] sm:$0xff]  ;;  %v244_v31 = vld [vmem:[%s916_s2] sm:$0xff]  ;;  %v254_v36 = vld [vmem:[%s916_s2 + $0x50] sm:$0xff]  ;;  %s623_s20 = sshll.u32 %s827_s19, 4  ;;  %s625_s8 = sshll.u32 %s1040_s9, 4  ;;  %s624_s20 = int_to_ptr.vmem [resolvable:$true] %s623_s20  ;;  %s626_s8 = int_to_ptr.hbm [resolvable:$true] %s625_s8 }
  0x21   :  { %v154_v27 = vld [vmem:[%s931_s23 + $0x38] sm:$0xff]  ;;  %v159_v32 = vld [vmem:[%s931_s23 + $0x60] sm:$0xff]  ;;  %v246_v37 = vld [vmem:[%s916_s2 + $0x10] sm:$0xff] }
  0x22   :  { %v255_v30 = vld [vmem:[%s916_s2 + $0x58] sm:$0xff]  ;;  %v151_v33 = vld [vmem:[%s931_s23 + $0x20] sm:$0xff]  ;;  %v160_v38 = vld [vmem:[%s931_s23 + $0x68] sm:$0xff] }
  0x23   :  { %677 = vmatpush.xpose.msra.mxu3 %v175_v3  ;;  %675 = vmatpush.xpose.msra.mxu1 %v175_v3  ;;  %v155_v34 = vld [vmem:[%s931_s23 + $0x40] sm:$0xff]  ;;  %v152_v39 = vld [vmem:[%s931_s23 + $0x28] sm:$0xff]  ;;  %v149_v41 = vld [vmem:[%s931_s23 + $0x10] sm:$0xff] }
  0x24   :  { %676 = vmatpush.xpose.msra.mxu2 %v175_v3  ;;  %182 = vmatpush.xpose.msra.mxu0 %v175_v3  ;;  %v156_v40 = vld [vmem:[%s931_s23 + $0x48] sm:$0xff]  ;;  %v251_v42 = vld [vmem:[%s916_s2 + $0x38] sm:$0xff]  ;;  %v161_v43 = vld [vmem:[%s931_s23 + $0x70] sm:$0xff] }
  0x25   :  { %333 = vperm.xlu0 %720, %v258_v11   ;;  %323 = vperm.xlu1 %721, %v256_v18   ;;  %v153_v44 = vld [vmem:[%s931_s23 + $0x30] sm:$0xff]  ;;  %v248_v46 = vld [vmem:[%s916_s2 + $0x20] sm:$0xff]  ;;  %v162_v47 = vld [vmem:[%s931_s23 + $0x78] sm:$0xff] }
  0x26   :  { %318 = vperm.xlu2 %722, %v255_v30   ;;  %v157_v45 = vld [vmem:[%s931_s23 + $0x50] sm:$0xff]  ;;  %v245_v48 = vld [vmem:[%s916_s2 + $0x8] sm:$0xff]  ;;  %v723_v3 = vld [vmem:[%s133_s15] ss:$0 sm:$0xff] }
  0x27   :  { %680 = vmatpush.xpose.msra.mxu3 %v174_v4  ;;  %678 = vmatpush.xpose.msra.mxu1 %v174_v4 }
  0x28   :  { %679 = vmatpush.xpose.msra.mxu2 %v174_v4  ;;  %183 = vmatpush.xpose.msra.mxu0 %v174_v4 }
  0x2b   :  { %683 = vmatpush.xpose.msra.mxu3 %v173_v5  ;;  %681 = vmatpush.xpose.msra.mxu1 %v173_v5 }
  0x2c   :  { %682 = vmatpush.xpose.msra.mxu2 %v173_v5  ;;  %184 = vmatpush.xpose.msra.mxu0 %v173_v5 }
  0x2d   :  { %308 = vperm.xlu0 %720, %v253_v15   ;;  %303 = vperm.xlu1 %721, %v252_v22  }
  0x2e   :  { %313 = vperm.xlu2 %722, %v254_v36  }
  0x2f   :  { %686 = vmatpush.xpose.msra.mxu3 %v172_v6  ;;  %684 = vmatpush.xpose.msra.mxu1 %v172_v6 }
  0x30   :  { %685 = vmatpush.xpose.msra.mxu2 %v172_v6  ;;  %185 = vmatpush.xpose.msra.mxu0 %v172_v6 }
  0x33   :  { %689 = vmatpush.xpose.msra.mxu3 %v171_v7  ;;  %687 = vmatpush.xpose.msra.mxu1 %v171_v7 }
  0x34   :  { %688 = vmatpush.xpose.msra.mxu2 %v171_v7  ;;  %186 = vmatpush.xpose.msra.mxu0 %v171_v7 }
  0x35   :  { %293 = vperm.xlu0 %720, %v250_v19   ;;  %288 = vperm.xlu1 %721, %v249_v29   ;;  %v964_v29 = vstv %s664_s25 }
  0x36   :  { %298 = vperm.xlu2 %722, %v251_v42  }
  0x37   :  { %692 = vmatpush.xpose.msra.mxu3 %v170_v10  ;;  %690 = vmatpush.xpose.msra.mxu1 %v170_v10 }
  0x38   :  { %691 = vmatpush.xpose.msra.mxu2 %v170_v10  ;;  %187 = vmatpush.xpose.msra.mxu0 %v170_v10 }
  0x3b   :  { %695 = vmatpush.xpose.msra.mxu3 %v169_v12  ;;  %693 = vmatpush.xpose.msra.mxu1 %v169_v12 }
  0x3c   :  { %694 = vmatpush.xpose.msra.mxu2 %v169_v12  ;;  %188 = vmatpush.xpose.msra.mxu0 %v169_v12 }
  0x3d   :  { %278 = vperm.xlu0 %720, %v247_v23   ;;  %273 = vperm.xlu1 %721, %v246_v37  }
  0x3e   :  { %283 = vperm.xlu2 %722, %v248_v46  }
  0x3f   :  { %698 = vmatpush.xpose.msra.mxu3 %v168_v13  ;;  %696 = vmatpush.xpose.msra.mxu1 %v168_v13 }
  0x40   :  { %697 = vmatpush.xpose.msra.mxu2 %v168_v13  ;;  %189 = vmatpush.xpose.msra.mxu0 %v168_v13 }
  0x43   :  { %701 = vmatpush.xpose.msra.mxu3 %v167_v16  ;;  %699 = vmatpush.xpose.msra.mxu1 %v167_v16 }
  0x44   :  { %700 = vmatpush.xpose.msra.mxu2 %v167_v16  ;;  %190 = vmatpush.xpose.msra.mxu0 %v167_v16 }
  0x45   :  { %263 = vperm.xlu0 %720, %v244_v31  }
  0x46   :  { %268 = vperm.xlu2 %722, %v245_v48  }
  0x47   :  { %704 = vmatpush.xpose.msra.mxu3 %v166_v17  ;;  %702 = vmatpush.xpose.msra.mxu1 %v166_v17 }
  0x48   :  { %703 = vmatpush.xpose.msra.mxu2 %v166_v17  ;;  %191 = vmatpush.xpose.msra.mxu0 %v166_v17 }
  0x4b   :  { %707 = vmatpush.xpose.msra.mxu3 %v165_v20  ;;  %705 = vmatpush.xpose.msra.mxu1 %v165_v20 }
  0x4c   :  { %706 = vmatpush.xpose.msra.mxu2 %v165_v20  ;;  %192 = vmatpush.xpose.msra.mxu0 %v165_v20 }
  0x4f   :  { %710 = vmatpush.xpose.msra.mxu3 %v164_v21  ;;  %708 = vmatpush.xpose.msra.mxu1 %v164_v21 }
  0x50   :  { %709 = vmatpush.xpose.msra.mxu2 %v164_v21  ;;  %193 = vmatpush.xpose.msra.mxu0 %v164_v21 }
  0x53   :  { %713 = vmatpush.xpose.msra.mxu3 %v163_v24  ;;  %711 = vmatpush.xpose.msra.mxu1 %v163_v24 }
  0x54   :  { %712 = vmatpush.xpose.msra.mxu2 %v163_v24  ;;  %194 = vmatpush.xpose.msra.mxu0 %v163_v24 }
  0x56   :  { %228 = vmatmul.f32.vlgmr.msra.gmra.mxu3 %v158_v25  ;;  %204 = vmatmul.f32.vlgmr.msra.gmra.mxu1 %v150_v26 }
  0x57   :  { %216 = vmatmul.f32.vlgmr.msra.gmra.mxu2 %v154_v27  ;;  %195 = vmatmul.f32.vlgmr.msra.gmra.mxu0 %v147_v28 }
  0x5e   :  { %231 = vmatmul.f32.gmra.mxu3 %v159_v32  ;;  %207 = vmatmul.f32.gmra.mxu1 %v151_v33 }
  0x5f   :  { %219 = vmatmul.f32.gmra.mxu2 %v155_v34  ;;  %198 = vmatmul.f32.gmra.mxu0 %v148_v35 }
  0x66   :  { %234 = vmatmul.f32.gmra.mxu3 %v160_v38  ;;  %210 = vmatmul.f32.gmra.mxu1 %v152_v39 }
  0x67   :  { %222 = vmatmul.f32.gmra.mxu2 %v156_v40  ;;  %201 = vmatmul.f32.gmra.mxu0 %v149_v41 }
  0x6e   :  { %237 = vmatmul.f32.gmra.mxu3 %v161_v43  ;;  %213 = vmatmul.f32.gmra.mxu1 %v153_v44 }
  0x6f   :  { %225 = vmatmul.f32.gmra.mxu2 %v157_v45 }
  0x76   :  { %240 = vmatmul.f32.gmra.mxu3 %v162_v47 }
  0x80   :  { %v319_v52 = vpop.permute.xlu2 %318 }
  0x81   :  { %v355_v6 = vadd.f32 %v723_v3, %v319_v52 }
  0x88   :  { %v314_v55 = vpop.permute.xlu2 %313 }
  0x89   :  { %v354_v30 = vadd.f32 %v723_v3, %v314_v55 }
  0x8f   :  { %v339_v49 = vpop.permute.xlu0 %338  ;;  %v329_v51 = vpop.permute.xlu1 %328 }
  0x90   :  { %v299_v61 = vpop.permute.xlu2 %298  ;;  %v357_v9 = vadd.f32 %v723_v3, %v329_v51  ;;  %v962_v17 = vadd.f32 %v723_v3, %v339_v49 }
  0x91   :  { %v351_v32 = vadd.f32 %v723_v3, %v299_v61 }
  0x97   :  { %v334_v50 = vpop.permute.xlu0 %333  ;;  %v324_v54 = vpop.permute.xlu1 %323 }
  0x98   :  { %v284_v5 = vpop.permute.xlu2 %283  ;;  %v356_v13 = vadd.f32 %v723_v3, %v324_v54  ;;  %v358_v18 = vadd.f32 %v723_v3, %v334_v50 }
  0x99   :  { %v348_v36 = vadd.f32 %v723_v3, %v284_v5 }
  0x9f   :  { %v309_v53 = vpop.permute.xlu0 %308  ;;  %v304_v60 = vpop.permute.xlu1 %303 }
  0xa0   :  { %v352_v20 = vadd.f32 %v723_v3, %v304_v60  ;;  %v353_v25 = vadd.f32 %v723_v3, %v309_v53  ;;  %v269_v39 = vpop.permute.xlu2 %268 }
  0xa1   :  { %v345_v53 = vadd.f32 %v723_v3, %v269_v39 }
  0xa7   :  { %v294_v57 = vpop.permute.xlu0 %293  ;;  %v289_v4 = vpop.permute.xlu1 %288 }
  0xa8   :  { %v966_v31 = vadd.f32 %v723_v3, %v294_v57  ;;  %v968_v35 = vadd.f32 %v723_v3, %v289_v4 }
  0xaf   :  { %v279_v0 = vpop.permute.xlu0 %278  ;;  %v274_v33 = vpop.permute.xlu1 %273 }
  0xb0   :  { %v347_v23 = vadd.f32 %v723_v3, %v279_v0  ;;  %v346_v47 = vadd.f32 %v723_v3, %v274_v33 }
  0xb7   :  { %v264_v16 = vpop.permute.xlu0 %263 }
  0xb8   :  { %v344_v28 = vadd.f32 %v723_v3, %v264_v16 }
  0xd3   :  { %v205_v56 = vpop.f32.mrf.mxu1 }
  0xd4   :  { %v196_v1 = vpop.f32.mrf.mxu0  ;;  %v363_v21 = vmul.f32 2.0, %v205_v56 }
  0xd5   :  { %v360_v26 = vmul.f32 2.0, %v196_v1 }
  0xd6   :  { %v379_v41 = vsub.f32 %v347_v23, %v363_v21 }
  0xd7   :  { %v376_v46 = vsub.f32 %v344_v28, %v360_v26 }
  0xd8   :  { %v395_v60 = vmax.f32 %v379_v41, 0.0 }
  0xd9   :  { %v229_v58 = vpop.f32.mrf.mxu3 }
  0xda   :  { %v217_v59 = vpop.f32.mrf.mxu2  ;;  %v371_v7 = vmul.f32 2.0, %v229_v58 }
  0xdb   :  { %v208_v62 = vpop.f32.mrf.mxu1  ;;  %v367_v49 = vmul.f32 2.0, %v217_v59 }
  0xdc   :  { %v199_v15 = vpop.f32.mrf.mxu0  ;;  %v387_v19 = vsub.f32 %v355_v6, %v371_v7  ;;  %v364_v50 = vmul.f32 2.0, %v208_v62 }
  0xdd   :  { %v361_v55 = vmul.f32 2.0, %v199_v15  ;;  %v383_v62 = vsub.f32 %v351_v32, %v367_v49 }
  0xde   :  { %v403_v34 = vmax.f32 %v387_v19, 0.0  ;;  %v380_v6 = vsub.f32 %v348_v36, %v364_v50  ;;  %v413_v19 = vmul.f32 %v964_v29, %v395_v60 }
  0xdf   :  { %v399_v21 = vmax.f32 %v383_v62, 0.0 }
  0xe0   :  { %v421_v54 = vmul.f32 %v964_v29, %v403_v34 }
  0xe1   :  { %v232_v63 = vpop.f32.mrf.mxu3  ;;  %v417_v34 = vmul.f32 %v964_v29, %v399_v21 }
  0xe2   :  { %v220_v2 = vpop.f32.mrf.mxu2  ;;  %v372_v14 = vmul.f32 2.0, %v232_v63  ;;  %v448_v7 = vmul.f32 1.442695, %v421_v54 }
  0xe3   :  { %v211_v10 = vpop.f32.mrf.mxu1  ;;  %v368_v22 = vmul.f32 2.0, %v220_v2  ;;  %v392_v2 = vmax.f32 %v376_v46, 0.0 }
  0xe4   :  { %v388_v27 = vsub.f32 %v356_v13, %v372_v14  ;;  %v202_v63 = vpop.f32.mrf.mxu0  ;;  %v365_v5 = vmul.f32 2.0, %v211_v10 }
  0xe5   :  { %v384_v40 = vsub.f32 %v352_v20, %v368_v22 }
  0xe6   :  { %v404_v45 = vmax.f32 %v388_v27, 0.0  ;;  %v381_v22 = vsub.f32 %v968_v35, %v365_v5 }
  0xe7   :  { %v400_v58 = vmax.f32 %v384_v40, 0.0 }
  0xe8   :  { %v422_v1 = vmul.f32 %v964_v29, %v404_v45  ;;  %v397_v35 = vmax.f32 %v381_v22, 0.0 }
  0xe9   :  { %v235_v8 = vpop.f32.mrf.mxu3  ;;  %v418_v13 = vmul.f32 %v964_v29, %v400_v58 }
  0xea   :  { %v373_v11 = vmul.f32 2.0, %v235_v8  ;;  %v223_v12 = vpop.f32.mrf.mxu2 }
  0xeb   :  { %v369_v37 = vmul.f32 2.0, %v223_v12  ;;  %v214_v51 = vpop.f32.mrf.mxu1  ;;  %v442_v27 = vmul.f32 1.442695, %v418_v13 }
  0xec   :  { %v389_v24 = vsub.f32 %v357_v9, %v373_v11  ;;  %v366_v4 = vmul.f32 2.0, %v214_v51  ;;  %v362_v9 = vmul.f32 2.0, %v202_v63  ;;  %v377_v11 = vsub.f32 %v345_v53, %v361_v55 }
  0xed   :  { %v385_v56 = vsub.f32 %v353_v25, %v369_v37 }
  0xee   :  { %v405_v42 = vmax.f32 %v389_v24, 0.0  ;;  %v382_v20 = vsub.f32 %v966_v31, %v366_v4  ;;  %v396_v24 = vmax.f32 %v380_v6, 0.0  ;;  %v393_v26 = vmax.f32 %v377_v11, 0.0 }
  0xef   :  { %v401_v8 = vmax.f32 %v385_v56, 0.0  ;;  %v378_v28 = vsub.f32 %v346_v47, %v362_v9  ;;  %v410_v31 = vmul.f32 %v964_v29, %v392_v2  ;;  %v440_v47 = vmul.f32 1.442695, %v417_v34 }
  0xf0   :  { %v423_v61 = vmul.f32 %v964_v29, %v405_v42  ;;  %v398_v32 = vmax.f32 %v382_v20, 0.0  ;;  %v414_v37 = vmul.f32 %v964_v29, %v396_v24  ;;  %v411_v41 = vmul.f32 %v964_v29, %v393_v26 }
  0xf1   :  { %v238_v38 = vpop.f32.mrf.mxu3  ;;  %v419_v25 = vmul.f32 %v964_v29, %v401_v8  ;;  %v394_v40 = vmax.f32 %v378_v28, 0.0 }
  0xf2   :  { %v374_v43 = vmul.f32 2.0, %v238_v38  ;;  %v226_v44 = vpop.f32.mrf.mxu2  ;;  %v452_v14 = vmul.f32 1.442695, %v423_v61  ;;  %v416_v45 = vmul.f32 %v964_v29, %v398_v32  ;;  %v434_v50 = vmul.f32 1.442695, %v414_v37 }
  0xf3   :  { %v370_v48 = vmul.f32 2.0, %v226_v44  ;;  %v444_v38 = vmul.f32 1.442695, %v419_v25  ;;  %v426_v44 = vmul.f32 1.442695, %v410_v31 }
  0xf4   :  { %v390_v52 = vsub.f32 %v358_v18, %v374_v43  ;;  %v450_v18 = vmul.f32 1.442695, %v422_v1  ;;  %v428_v53 = vmul.f32 1.442695, %v411_v41  ;;  %v438_v55 = vmul.f32 1.442695, %v416_v45 }
  0xf5   :  { %v386_v57 = vsub.f32 %v354_v30, %v370_v48  ;;  %v415_v48 = vmul.f32 %v964_v29, %v397_v35 }
  0xf6   :  { %v406_v0 = vmax.f32 %v390_v52, 0.0  ;;  %v412_v52 = vmul.f32 %v964_v29, %v394_v40 }
  0xf7   :  { %v402_v59 = vmax.f32 %v386_v57, 0.0  ;;  %v436_v58 = vmul.f32 1.442695, %v415_v48 }
  0xf8   :  { %v424_v3 = vmul.f32 %v964_v29, %v406_v0  ;;  %v430_v2 = vmul.f32 1.442695, %v412_v52 }
  0xf9   :  { %v241_v12 = vpop.f32.mrf.mxu3  ;;  %v420_v10 = vmul.f32 %v964_v29, %v402_v59 }
  0xfa   :  { %v454_v15 = vmul.f32 1.442695, %v424_v3  ;;  %v375_v16 = vmul.f32 2.0, %v241_v12 }
  0xfb   :  { %v446_v33 = vmul.f32 1.442695, %v420_v10 }
  0xfc   :  { %724 = vpow2.f32 %v454_v15  ;;  %v391_v23 = vsub.f32 %v962_v17, %v375_v16  ;;  %v432_v17 = vmul.f32 1.442695, %v413_v19 }
  0xfd   :  { %726 = vpow2.f32 %v448_v7 }
  0xfe   :  { %728 = vpow2.f32 %v452_v14  ;;  %v407_v30 = vmax.f32 %v391_v23, 0.0 }
  0xff   :  { %730 = vpow2.f32 %v450_v18 }
 0x100   :  { %v425_v36 = vmul.f32 %v964_v29, %v407_v30  ;;  %732 = vpow2.f32 %v442_v27 }
 0x101   :  { %734 = vpow2.f32 %v446_v33 }
 0x102   :  { %v725_v39 = vpop.eup %724  ;;  %v456_v42 = vmul.f32 1.442695, %v425_v36 }
 0x103   :  { %v727_v43 = vpop.eup %726  ;;  %v472_v51 = vmul.f32 %v725_v39, %v725_v39 }
 0x104   :  { %v729_v46 = vpop.eup %728  ;;  %736 = vpow2.f32 %v456_v42  ;;  %v469_v54 = vmul.f32 %v727_v43, %v727_v43 }
 0x105   :  { %v731_v49 = vpop.eup %730  ;;  %738 = vpow2.f32 %v444_v38  ;;  %v471_v56 = vmul.f32 %v729_v46, %v729_v46  ;;  %v488_v63 = vadd.f32 %v725_v39, %v472_v51  ;;  %v504_v0 = vmul.f32 %v472_v51, %v472_v51 }
 0x106   :  { %740 = vpow2.f32 %v432_v17  ;;  %v733_v57 = vpop.eup %732  ;;  %v470_v60 = vmul.f32 %v731_v49, %v731_v49  ;;  %v485_v4 = vadd.f32 %v727_v43, %v469_v54  ;;  %v501_v16 = vmul.f32 %v469_v54, %v469_v54 }
 0x107   :  { %742 = vpow2.f32 %v426_v44  ;;  %v735_v61 = vpop.eup %734  ;;  %v487_v62 = vadd.f32 %v729_v46, %v471_v56  ;;  %v503_v5 = vmul.f32 %v471_v56, %v471_v56  ;;  %v520_v13 = vadd.f32 %v504_v0, %v488_v63 }
 0x108   :  { %744 = vpow2.f32 %v440_v47  ;;  %v486_v3 = vadd.f32 %v731_v49, %v470_v60  ;;  %v502_v7 = vmul.f32 %v470_v60, %v470_v60  ;;  %v468_v8 = vmul.f32 %v735_v61, %v735_v61 }
 0x109   :  { %746 = vpow2.f32 %v434_v50  ;;  %v536_v14 = vmul.f32 %v504_v0, %v504_v0  ;;  %v466_v19 = vmul.f32 %v733_v57, %v733_v57  ;;  %v519_v22 = vadd.f32 %v503_v5, %v487_v62 }
 0x10a   :  { %v737_v1 = vpop.eup %736  ;;  %748 = vpow2.f32 %v428_v53  ;;  %v535_v23 = vmul.f32 %v503_v5, %v503_v5  ;;  %v518_v25 = vadd.f32 %v502_v7, %v486_v3  ;;  %v534_v26 = vmul.f32 %v502_v7, %v502_v7 }
 0x10b   :  { %v739_v59 = vpop.eup %738  ;;  %750 = vpow2.f32 %v438_v55  ;;  %v473_v29 = vmul.f32 %v737_v1, %v737_v1  ;;  %v484_v27 = vadd.f32 %v735_v61, %v468_v8  ;;  %v500_v28 = vmul.f32 %v468_v8, %v468_v8 }
 0x10c   :  { %v989_v6 = vpop.eup %740  ;;  %752 = vpow2.f32 %v436_v58  ;;  %v467_v18 = vmul.f32 %v739_v59, %v739_v59  ;;  %v552_v33 = vadd.f32 %v536_v14, %v520_v13  ;;  %v568_v34 = vmul.f32 %v536_v14, %v536_v14 }
 0x10d   :  { %v991_v9 = vpop.eup %742  ;;  %v489_v11 = vadd.f32 %v737_v1, %v473_v29  ;;  %v505_v12 = vmul.f32 %v473_v29, %v473_v29  ;;  %754 = vpow2.f32 %v430_v2  ;;  %v517_v36 = vadd.f32 %v501_v16, %v485_v4 }
 0x10e   :  { %v745_v15 = vpop.eup %744  ;;  %v533_v17 = vmul.f32 %v501_v16, %v501_v16  ;;  %v483_v37 = vadd.f32 %v739_v59, %v467_v18  ;;  %v551_v40 = vadd.f32 %v535_v23, %v519_v22  ;;  %v567_v41 = vmul.f32 %v535_v23, %v535_v23 }
 0x10f   :  { %v993_v20 = vpop.eup %746  ;;  %v521_v10 = vadd.f32 %v505_v12, %v489_v11  ;;  %v537_v21 = vmul.f32 %v505_v12, %v505_v12  ;;  %v465_v38 = vmul.f32 %v745_v15, %v745_v15  ;;  %v499_v42 = vmul.f32 %v467_v18, %v467_v18 }
 0x110   :  { %v995_v24 = vpop.eup %748  ;;  %v550_v44 = vadd.f32 %v534_v26, %v518_v25  ;;  %v482_v45 = vadd.f32 %v733_v57, %v466_v19  ;;  %v498_v46 = vmul.f32 %v466_v19, %v466_v19  ;;  %v584_v48 = vadd.f32 %v568_v34, %v552_v33 }
 0x111   :  { %v751_v30 = vpop.eup %750  ;;  %v553_v31 = vadd.f32 %v537_v21, %v521_v10  ;;  %v569_v32 = vmul.f32 %v537_v21, %v537_v21  ;;  %v566_v49 = vmul.f32 %v534_v26, %v534_v26  ;;  %v516_v50 = vadd.f32 %v500_v28, %v484_v27 }
 0x112   :  { %v753_v35 = vpop.eup %752  ;;  %v464_v47 = vmul.f32 %v751_v30, %v751_v30  ;;  %v532_v51 = vmul.f32 %v500_v28, %v500_v28  ;;  %v549_v52 = vadd.f32 %v533_v17, %v517_v36  ;;  %v565_v53 = vmul.f32 %v533_v17, %v533_v17 }
 0x113   :  { %v585_v39 = vadd.f32 %v569_v32, %v553_v31  ;;  %v755_v43 = vpop.eup %754  ;;  %v481_v54 = vadd.f32 %v745_v15, %v465_v38  ;;  %v463_v55 = vmul.f32 %v753_v35, %v753_v35  ;;  %v583_v56 = vadd.f32 %v567_v41, %v551_v40 }
 0x114   :  { %v515_v58 = vadd.f32 %v499_v42, %v483_v37  ;;  %v531_v60 = vmul.f32 %v499_v42, %v499_v42  ;;  %v497_v61 = vmul.f32 %v465_v38, %v465_v38  ;;  %v514_v63 = vadd.f32 %v498_v46, %v482_v45 }
 0x115   :  { %587 = vmatpush.msrb.mxu1 %v585_v39  ;;  %v480_v0 = vadd.f32 %v751_v30, %v464_v47  ;;  %v496_v1 = vmul.f32 %v464_v47, %v464_v47  ;;  %v462_v57 = vmul.f32 %v993_v20, %v993_v20  ;;  %v582_v2 = vadd.f32 %v566_v49, %v550_v44 }
 0x116   :  { %v548_v4 = vadd.f32 %v532_v51, %v516_v50  ;;  %v564_v59 = vmul.f32 %v532_v51, %v532_v51  ;;  %v530_v29 = vmul.f32 %v498_v46, %v498_v46  ;;  %v581_v62 = vadd.f32 %v565_v53, %v549_v52 }
 0x117   :  { %588 = vmatpush.msrb.mxu1 %v584_v48  ;;  %v479_v5 = vadd.f32 %v753_v35, %v463_v55  ;;  %v495_v3 = vmul.f32 %v463_v55, %v463_v55  ;;  %v461_v7 = vmul.f32 %v989_v6, %v989_v6  ;;  %v547_v8 = vadd.f32 %v531_v60, %v515_v58 }
 0x118   :  { %v563_v11 = vmul.f32 %v531_v60, %v531_v60  ;;  %v513_v12 = vadd.f32 %v497_v61, %v481_v54  ;;  %v529_v13 = vmul.f32 %v497_v61, %v497_v61  ;;  %v512_v14 = vadd.f32 %v496_v1, %v480_v0 }
 0x119   :  { %589 = vmatpush.msrb.mxu1 %v583_v56  ;;  %v528_v15 = vmul.f32 %v496_v1, %v496_v1  ;;  %v478_v16 = vadd.f32 %v993_v20, %v462_v57  ;;  %v494_v18 = vmul.f32 %v462_v57, %v462_v57  ;;  %v580_v19 = vadd.f32 %v564_v59, %v548_v4 }
 0x11a   :  { %v546_v10 = vadd.f32 %v530_v29, %v514_v63  ;;  %v562_v21 = vmul.f32 %v530_v29, %v530_v29  ;;  %v460_v22 = vmul.f32 %v755_v43, %v755_v43  ;;  %v511_v23 = vadd.f32 %v495_v3, %v479_v5  ;;  %v607_v5 = vld [vmem:[%s143_s14] sm:$0x1] }
 0x11b   :  { %590 = vmatpush.msrb.mxu1 %v582_v2  ;;  %v527_v25 = vmul.f32 %v495_v3, %v495_v3  ;;  %v477_v26 = vadd.f32 %v989_v6, %v461_v7  ;;  %v493_v27 = vmul.f32 %v461_v7, %v461_v7  ;;  %v579_v28 = vadd.f32 %v563_v11, %v547_v8 }
 0x11c   :  { %v545_v30 = vadd.f32 %v529_v13, %v513_v12  ;;  %v561_v31 = vmul.f32 %v529_v13, %v529_v13  ;;  %v459_v32 = vmul.f32 %v995_v24, %v995_v24  ;;  %v544_v33 = vadd.f32 %v528_v15, %v512_v14 }
 0x11d   :  { %591 = vmatpush.msrb.mxu1 %v581_v62  ;;  %v560_v20 = vmul.f32 %v528_v15, %v528_v15  ;;  %v510_v34 = vadd.f32 %v494_v18, %v478_v16  ;;  %v526_v35 = vmul.f32 %v494_v18, %v494_v18  ;;  %v578_v36 = vadd.f32 %v562_v21, %v546_v10  ;;  %v586_v62 = vld [vmem:[%s138_s11] sm:$0x1] }
 0x11e   :  { %v476_v17 = vadd.f32 %v755_v43, %v460_v22  ;;  %v492_v37 = vmul.f32 %v460_v22, %v460_v22  ;;  %v458_v38 = vmul.f32 %v991_v9, %v991_v9  ;;  %v543_v6 = vadd.f32 %v527_v25, %v511_v23 }
 0x11f   :  { %592 = vmatpush.msrb.mxu1 %v580_v19  ;;  %v559_v39 = vmul.f32 %v527_v25, %v527_v25  ;;  %v509_v40 = vadd.f32 %v493_v27, %v477_v26  ;;  %v577_v41 = vadd.f32 %v561_v31, %v545_v30  ;;  %v525_v42 = vmul.f32 %v493_v27, %v493_v27 }
 0x120   :  { %v475_v44 = vadd.f32 %v995_v24, %v459_v32  ;;  %v491_v45 = vmul.f32 %v459_v32, %v459_v32  ;;  %v576_v46 = vadd.f32 %v560_v20, %v544_v33  ;;  %v542_v47 = vadd.f32 %v526_v35, %v510_v34 }
 0x121   :  { %593 = vmatpush.msrb.mxu1 %v579_v28  ;;  %v558_v48 = vmul.f32 %v526_v35, %v526_v35  ;;  %v508_v49 = vadd.f32 %v492_v37, %v476_v17  ;;  %v524_v50 = vmul.f32 %v492_v37, %v492_v37  ;;  %v474_v43 = vadd.f32 %v991_v9, %v458_v38 }
 0x122   :  { %v490_v51 = vmul.f32 %v458_v38, %v458_v38  ;;  %v575_v52 = vadd.f32 %v559_v39, %v543_v6  ;;  %v541_v53 = vadd.f32 %v525_v42, %v509_v40  ;;  %v557_v54 = vmul.f32 %v525_v42, %v525_v42 }
 0x123   :  { %594 = vmatpush.msrb.mxu1 %v578_v36  ;;  %v507_v55 = vadd.f32 %v491_v45, %v475_v44  ;;  %v523_v24 = vmul.f32 %v491_v45, %v491_v45  ;;  %v574_v56 = vadd.f32 %v558_v48, %v542_v47  ;;  %v540_v58 = vadd.f32 %v524_v50, %v508_v49 }
 0x124   :  { %v556_v60 = vmul.f32 %v524_v50, %v524_v50  ;;  %v506_v61 = vadd.f32 %v490_v51, %v474_v43  ;;  %v522_v63 = vmul.f32 %v490_v51, %v490_v51  ;;  %v573_v9 = vadd.f32 %v557_v54, %v541_v53 }
 0x125   :  { %595 = vmatpush.msrb.mxu1 %v577_v41  ;;  %v539_v0 = vadd.f32 %v523_v24, %v507_v55  ;;  %v555_v1 = vmul.f32 %v523_v24, %v523_v24  ;;  %v615_v11 = vstv %s614_s18 }
 0x126   :  { %v572_v57 = vadd.f32 %v556_v60, %v540_v58  ;;  %v538_v2 = vadd.f32 %v522_v63, %v506_v61  ;;  %v554_v4 = vmul.f32 %v522_v63, %v522_v63 }
 0x127   :  { %596 = vmatpush.msrb.mxu1 %v576_v46  ;;  %v571_v59 = vadd.f32 %v555_v1, %v539_v0 }
 0x128   :  { %v570_v29 = vadd.f32 %v554_v4, %v538_v2 }
 0x129   :  { %597 = vmatpush.msrb.mxu1 %v575_v52 }
 0x12b   :  { %598 = vmatpush.msrb.mxu1 %v574_v56 }
 0x12d   :  { %599 = vmatpush.msrb.mxu1 %v573_v9 }
 0x12f   :  { %600 = vmatpush.msrb.mxu1 %v572_v57 }
 0x131   :  { %601 = vmatpush.msrb.mxu1 %v571_v59 }
 0x133   :  { %602 = vmatpush.msrb.mxu1 %v570_v29 }
 0x134   :  { %603 = vmatmul.f32.vlgmr.msrb.gmra.mxu1 %v586_v62 }
 0x1b1   :  { %v604_v3 = vpop.f32.mrf.mxu1 }
 0x1b2   :  { %v608_v7 = vmul.f32 %v607_v5, %v604_v3 }
 0x1b4   :  { %v610_v8 = vsel %vm609_vm0, %v608_v7, 0.0 }
 0x1b5   :  { %611 = vadd.xlane.f32.xlu1 %v610_v8 }
 0x228   :  { %v612_v12 = vpop.xlane.xlu1 %611 }
 0x229   :  { %v616_v13 = vmul.f32 %v615_v11, %v612_v12 }
 0x22b   :  { %617 = vst [vmem:[#allocation9] sm:$0x1] %v616_v13 }
 0x22c   :  { %628 = dma.vmem_to_hbm [thread:$0]  %s624_s20, 16, %s626_s8, [#allocation8]  }
 0x22d   :  { %820 = dma.done.wait [#allocation8], 16  }
 0x22e   :  { %821 = vsyncadd [#allocation8], 4294967280 }
 0x22f   :  { %633 = vsyncpa [#allocation7], 1 }
 0x230   :  { %634 = vsyncpa [#allocation8], 1 }

</bundles_post_ra>
